<compile_context>
chip_gen: v7x
topology: tpu7x:2x2x1
jax: 0.10.0
libtpu: 0.0.40
codegen_flags: <defaults>
</compile_context>

<pallas_src>
import functools
import math

import jax
import jax.numpy as jnp
from jax.experimental import pallas as pl
from jax.experimental.pallas import tpu as pltpu

_LANE = 128
_TARGET_BLOCK_BYTES = 4 * 1024 * 1024      # target input-block DMA size
_VMEM_CAP_BYTES = 48 * 1024 * 1024         # stays inside v7x's 64 MiB VMEM
_MAX_PACK_WIDTH = 512                      # largest lcm-packed lane width


# ----------------------------- kernels ------------------------------------- #

def _layernorm_kernel(x_ref, gamma_ref, beta_ref, o_ref, *, eps: float, d_model: int):
    # x_ref: (block_rows, d_model); gamma/beta: (1, d_model).
    x = x_ref[...].astype(jnp.float32)
    inv_n = 1.0 / float(d_model)
    mean = jnp.sum(x, axis=-1, keepdims=True) * inv_n
    xc = x - mean
    var = jnp.sum(xc * xc, axis=-1, keepdims=True) * inv_n   # unbiased=False
    inv_std = jax.lax.rsqrt(var + eps)
    gamma = gamma_ref[...].astype(jnp.float32)
    beta = beta_ref[...].astype(jnp.float32)
    o_ref[...] = ((xc * inv_std) * gamma + beta).astype(o_ref.dtype)


def _layernorm_packed_kernel(x_ref, gamma_ref, beta_ref, seg_ref, o_ref, *,
                             eps: float, d_model: int):
    # x_ref: (block_rows, width); each physical row holds width // d_model
    # logical rows. seg_ref: (width, width) 0/1 matrix; x @ seg = per-segment
    # sums broadcast back, so everything stays lane-dense (unmasked vst).
    x = x_ref[...].astype(jnp.float32)
    seg = seg_ref[...]
    inv_n = 1.0 / float(d_model)
    mean = jnp.dot(x, seg, preferred_element_type=jnp.float32) * inv_n
    xc = x - mean
    var = jnp.dot(xc * xc, seg, preferred_element_type=jnp.float32) * inv_n
    inv_std = jax.lax.rsqrt(var + eps)
    gamma = gamma_ref[...].astype(jnp.float32)
    beta = beta_ref[...].astype(jnp.float32)
    o_ref[...] = ((xc * inv_std) * gamma + beta).astype(o_ref.dtype)


# --------------------------- tiling helpers --------------------------------- #

def _sublane_multiple(dtype) -> int:
    # 8 rows for f32, 16 for bf16, 32 for int8/fp8.
    return max(8, 32 // jnp.dtype(dtype).itemsize)


def _round_up(n: int, m: int) -> int:
    return ((n + m - 1) // m) * m


def _vmem_need_bytes(br: int, width: int, dtype, *, packed: bool) -> int:
    itemsize = jnp.dtype(dtype).itemsize
    io = br * width * itemsize
    f32 = br * width * 4
    need = 2 * io + 2 * io + 3 * f32           # dbl-buffered in/out + live f32 temps
    need += 4 * width * max(itemsize, 4)       # gamma/beta (dbl-buffered, tiny)
    if packed:
        need += 2 * width * width * 4          # segment matrix (dbl-buffered)
    return int(need * 1.25)                    # headroom for compiler scratch


def _fit_block_rows_to_vmem(br: int, width: int, dtype, mult: int, *, packed: bool) -> int:
    while br > mult and _vmem_need_bytes(br, width, dtype, packed=packed) > _VMEM_CAP_BYTES:
        br = max(mult, (br // 2 // mult) * mult)
    return br


def _choose_block_rows(rows: int, width: int, dtype, *, packed: bool) -> int:
    mult = _sublane_multiple(dtype)
    if rows <= mult:
        return rows
    itemsize = jnp.dtype(dtype).itemsize
    br = max(mult, _TARGET_BLOCK_BYTES // (width * itemsize))
    br = max(mult, (br // mult) * mult)            # sublane-aligned
    br = min(br, _round_up(rows, mult))            # no point exceeding the array
    br = _fit_block_rows_to_vmem(br, width, dtype, mult, packed=packed)
    # v7x megacore: keep the ("parallel",) grid evenly splittable across the
    # two TensorCores. On single-TC v5e/v6e the extra step is negligible.
    steps = pl.cdiv(rows, br)
    if steps % 2 == 1 and rows > mult:
        steps += 1
        br = max(mult, _round_up(pl.cdiv(rows, steps), mult))
    return br


def _clamp_block_rows(br: int, rows: int, width: int, dtype, *, packed: bool) -> int:
    mult = _sublane_multiple(dtype)
    br = max(1, min(br, rows))
    if rows >= mult:
        br = max(mult, (br // mult) * mult)
    else:
        br = rows
    return _fit_block_rows_to_vmem(br, width, dtype, mult, packed=packed)


def _vmem_limit(br: int, width: int, dtype, *, packed: bool) -> int:
    need = _vmem_need_bytes(br, width, dtype, packed=packed)
    return max(32 * 1024 * 1024, min(need, _VMEM_CAP_BYTES))


# ------------------------------ wrapper ------------------------------------- #

def layer_norm(x, gamma, beta, *, eps: float = 1e-12, block_rows=None):
    """LayerNorm over the last axis (torch semantics: biased var, eps inside sqrt)."""
    orig_shape = x.shape
    d_model = int(orig_shape[-1])
    rows = 1
    for s in orig_shape[:-1]:
        rows *= int(s)

    gamma2d = jnp.asarray(gamma).reshape(1, d_model)
    beta2d = jnp.asarray(beta).reshape(1, d_model)

    # Lane-dense packing: fold k = lcm(d_model, 128) / d_model logical rows into
    # one lcm(d_model, 128)-lane physical row (unmasked loads/stores).
    width = d_model * _LANE // math.gcd(d_model, _LANE)
    k = width // d_model
    pack = (k > 1 and width <= _MAX_PACK_WIDTH and rows > 0 and rows % k == 0)

    if pack:
        prows = rows // k
        x2d = x.reshape(prows, width)
        gamma_in = jnp.tile(gamma2d, (1, k))
        beta_in = jnp.tile(beta2d, (1, k))
        seg_ids = jnp.arange(width, dtype=jnp.int32) // d_model
        seg_mat = (seg_ids[:, None] == seg_ids[None, :]).astype(jnp.float32)

        if block_rows is None:
            br = _choose_block_rows(prows, width, x.dtype, packed=True)
        else:
            br = _clamp_block_rows(int(block_rows), prows, width, x.dtype, packed=True)
        grid = (pl.cdiv(prows, br),)
        kernel = functools.partial(_layernorm_packed_kernel, eps=eps, d_model=d_model)

        out2d = pl.pallas_call(
            kernel,
            out_shape=jax.ShapeDtypeStruct((prows, width), x.dtype),
            grid_spec=pltpu.PrefetchScalarGridSpec(
                num_scalar_prefetch=0,
                grid=grid,
                in_specs=[
                    pl.BlockSpec((br, width), lambda i: (i, 0)),
                    pl.BlockSpec((1, width), lambda i: (0, 0)),
                    pl.BlockSpec((1, width), lambda i: (0, 0)),
                    pl.BlockSpec((width, width), lambda i: (0, 0)),
                ],
                out_specs=pl.BlockSpec((br, width), lambda i: (i, 0)),
            ),
            compiler_params=pltpu.CompilerParams(
                dimension_semantics=("parallel",),
                vmem_limit_bytes=_vmem_limit(br, width, x.dtype, packed=True),
            ),
        )(x2d, gamma_in, beta_in, seg_mat)
        return out2d.reshape(orig_shape)

    # Standard path: full feature rows per block row; tail block via cdiv grid.
    # TODO(synk): shapes where d_model is not a multiple of 128 and either
    # lcm(d_model,128) > _MAX_PACK_WIDTH or rows % k != 0 still take this
    # lane-sparse (masked-store) path; correct, just not lane-dense.
    x2d = x.reshape(rows, d_model)
    if block_rows is None:
        br = _choose_block_rows(rows, d_model, x.dtype, packed=False)
    else:
        br = _clamp_block_rows(int(block_rows), rows, d_model, x.dtype, packed=False)
    grid = (pl.cdiv(rows, br),)
    kernel = functools.partial(_layernorm_kernel, eps=eps, d_model=d_model)

    out2d = pl.pallas_call(
        kernel,
        out_shape=jax.ShapeDtypeStruct((rows, d_model), x.dtype),
        grid_spec=pltpu.PrefetchScalarGridSpec(
            num_scalar_prefetch=0,
            grid=grid,
            in_specs=[
                pl.BlockSpec((br, d_model), lambda i: (i, 0)),
                pl.BlockSpec((1, d_model), lambda i: (0, 0)),
                pl.BlockSpec((1, d_model), lambda i: (0, 0)),
            ],
            out_specs=pl.BlockSpec((br, d_model), lambda i: (i, 0)),
        ),
        compiler_params=pltpu.CompilerParams(
            dimension_semantics=("parallel",),
            vmem_limit_bytes=_vmem_limit(br, d_model, x.dtype, packed=False),
        ),
    )(x2d, gamma2d, beta2d)
    return out2d.reshape(orig_shape)


# ------------------------------ reference ----------------------------------- #

def layer_norm_ref(x, gamma, beta, eps=1e-12):
    xf = x.astype(jnp.float32)
    mean = jnp.mean(xf, axis=-1, keepdims=True)
    var = jnp.mean((xf - mean) ** 2, axis=-1, keepdims=True)
    out = (xf - mean) / jnp.sqrt(var + eps)
    return (gamma.astype(jnp.float32) * out + beta.astype(jnp.float32)).astype(x.dtype)


if __name__ == "__main__":
    eps = 1e-12
    key = jax.random.PRNGKey(0)
    k1, k2, k3, k4 = jax.random.split(key, 4)

    # Case 1: module-style shape, narrow d_model -> packed lane-dense path (width=128).
    batch, seq, d_model = 2, 16, 32
    x1 = jax.random.normal(k1, (batch, seq, d_model), dtype=jnp.float32)
    g1 = jnp.ones((d_model,), dtype=jnp.float32)    # nn.Parameter(torch.ones)
    b1 = jnp.zeros((d_model,), dtype=jnp.float32)   # nn.Parameter(torch.zeros)
    o1 = jax.block_until_ready(layer_norm(x1, g1, b1, eps=eps))
    assert o1.shape == x1.shape
    assert jnp.allclose(o1, layer_norm_ref(x1, g1, b1, eps=eps), atol=1e-5, rtol=1e-5), \
        "packed (width=128) path mismatch"

    # Case 2: lane-dense standard path (d_model multiple of 128), non-trivial affine.
    x2 = jax.random.normal(k2, (2, 8, 256), dtype=jnp.float32)
    g2 = jax.random.normal(jax.random.PRNGKey(1), (256,), dtype=jnp.float32)
    b2 = jax.random.normal(jax.random.PRNGKey(2), (256,), dtype=jnp.float32)
    o2 = jax.block_until_ready(layer_norm(x2, g2, b2, eps=eps))
    assert jnp.allclose(o2, layer_norm_ref(x2, g2, b2, eps=eps), atol=1e-5, rtol=1e-5), \
        "standard path mismatch"

    # Case 3: ragged row count (partial tail grid block) + awkward d_model -> standard path.
    x3 = jax.random.normal(k3, (3, 5, 48), dtype=jnp.float32)
    g3 = jax.random.normal(jax.random.PRNGKey(3), (48,), dtype=jnp.float32)
    b3 = jax.random.normal(jax.random.PRNGKey(4), (48,), dtype=jnp.float32)
    o3 = jax.block_until_ready(layer_norm(x3, g3, b3, eps=eps))
    assert jnp.allclose(o3, layer_norm_ref(x3, g3, b3, eps=eps), atol=1e-5, rtol=1e-5), \
        "tail/ragged path mismatch"

    # Case 4: d_model=48 with rows divisible by k -> generalized packed path (width=384).
    x4 = jax.random.normal(k4, (4, 16, 48), dtype=jnp.float32)
    g4 = jax.random.normal(jax.random.PRNGKey(5), (48,), dtype=jnp.float32)
    b4 = jax.random.normal(jax.random.PRNGKey(6), (48,), dtype=jnp.float32)
    o4 = jax.block_until_ready(layer_norm(x4, g4, b4, eps=eps))
    assert jnp.allclose(o4, layer_norm_ref(x4, g4, b4, eps=eps), atol=1e-5, rtol=1e-5), \
        "packed (lcm width=384) path mismatch"

    print("KERNEL_OK")
</pallas_src>

<mosaic_0001>
module attributes {stable_mosaic.version = 11 : i64} {
  func.func @_layernorm_packed_kernel(%arg0: i32, %arg1: memref<8x128xf32, #tpu.memory_space<vmem>>, %arg2: memref<1x128xf32, #tpu.memory_space<vmem>>, %arg3: memref<1x128xf32, #tpu.memory_space<vmem>>, %arg4: memref<128x128xf32, #tpu.memory_space<vmem>>, %arg5: memref<8x128xf32, #tpu.memory_space<vmem>>) attributes {dimension_semantics = [#tpu.dimension_semantics<parallel>], iteration_bounds = array<i64: 1>, scalar_prefetch = 0 : i64, scratch_operands = 0 : i64, tpu.core_type = #tpu.core_type<tc>, window_params = [{transform_indices = @transform_0, window_bounds = array<i64: 8, 128>}, {pipeline_mode = #tpu.pipeline_mode<synchronous>, transform_indices = @transform_1, window_bounds = array<i64: 1, 128>}, {pipeline_mode = #tpu.pipeline_mode<synchronous>, transform_indices = @transform_2, window_bounds = array<i64: 1, 128>}, {pipeline_mode = #tpu.pipeline_mode<synchronous>, transform_indices = @transform_3, window_bounds = array<i64: 128, 128>}, {transform_indices = @transform_4, window_bounds = array<i64: 8, 128>}]} {
    %c0 = arith.constant 0 : index
    %c0_0 = arith.constant 0 : index
    %0 = vector.load %arg1[%c0, %c0_0] : memref<8x128xf32, #tpu.memory_space<vmem>>, vector<8x128xf32>
    %c0_1 = arith.constant 0 : index
    %c0_2 = arith.constant 0 : index
    %1 = vector.load %arg4[%c0_1, %c0_2] : memref<128x128xf32, #tpu.memory_space<vmem>>, vector<128x128xf32>
    %cst = arith.constant dense<0.000000e+00> : vector<8x128xf32>
    %2 = tpu.matmul %0, %1, %cst {dimension_numbers = #tpu.dot_dimension_numbers<[1], [0], [0], [1], [0, 0, 1, 1], [], []>} : vector<8x128xf32>, vector<128x128xf32>, vector<8x128xf32> -> vector<8x128xf32>
    %cst_3 = arith.constant 3.125000e-02 : f32
    %3 = vector.broadcast %cst_3 : f32 to vector<8x128xf32>
    %4 = arith.mulf %2, %3 : vector<8x128xf32>
    %5 = arith.subf %0, %4 : vector<8x128xf32>
    %6 = arith.mulf %5, %5 : vector<8x128xf32>
    %cst_4 = arith.constant dense<0.000000e+00> : vector<8x128xf32>
    %7 = tpu.matmul %6, %1, %cst_4 {dimension_numbers = #tpu.dot_dimension_numbers<[1], [0], [0], [1], [0, 0, 1, 1], [], []>} : vector<8x128xf32>, vector<128x128xf32>, vector<8x128xf32> -> vector<8x128xf32>
    %cst_5 = arith.constant 3.125000e-02 : f32
    %8 = vector.broadcast %cst_5 : f32 to vector<8x128xf32>
    %9 = arith.mulf %7, %8 : vector<8x128xf32>
    %cst_6 = arith.constant 9.99999996E-13 : f32
    %10 = vector.broadcast %cst_6 : f32 to vector<8x128xf32>
    %11 = arith.addf %9, %10 : vector<8x128xf32>
    %12 = math.rsqrt %11 : vector<8x128xf32>
    %c0_7 = arith.constant 0 : index
    %c0_8 = arith.constant 0 : index
    %13 = vector.load %arg2[%c0_7, %c0_8] : memref<1x128xf32, #tpu.memory_space<vmem>>, vector<1x128xf32>
    %c0_9 = arith.constant 0 : index
    %c0_10 = arith.constant 0 : index
    %14 = vector.load %arg3[%c0_9, %c0_10] : memref<1x128xf32, #tpu.memory_space<vmem>>, vector<1x128xf32>
    %15 = arith.mulf %5, %12 : vector<8x128xf32>
    %16 = vector.broadcast %13 : vector<1x128xf32> to vector<8x128xf32>
    %17 = arith.mulf %15, %16 : vector<8x128xf32>
    %18 = vector.broadcast %14 : vector<1x128xf32> to vector<8x128xf32>
    %19 = arith.addf %17, %18 : vector<8x128xf32>
    %c0_11 = arith.constant 0 : index
    %c0_12 = arith.constant 0 : index
    %20 = vector.load %arg5[%c0_11, %c0_12] : memref<8x128xf32, #tpu.memory_space<vmem>>, vector<8x128xf32>
    tpu.vector_store %arg5[%c0_11, %c0_12], %19 {strides = array<i32>} : memref<8x128xf32, #tpu.memory_space<vmem>>, vector<8x128xf32>,
    return
  }
  func.func @transform_0(%arg0: i32) -> (i32, i32) {
    %c0_i32 = arith.constant 0 : i32
    %c0_i32_0 = arith.constant 0 : i32
    return %arg0, %c0_i32 : i32, i32
  }
  func.func @transform_1(%arg0: i32) -> (i32, i32) {
    %c0_i32 = arith.constant 0 : i32
    %c0_i32_0 = arith.constant 0 : i32
    %c0_i32_1 = arith.constant 0 : i32
    return %c0_i32, %c0_i32_0 : i32, i32
  }
  func.func @transform_2(%arg0: i32) -> (i32, i32) {
    %c0_i32 = arith.constant 0 : i32
    %c0_i32_0 = arith.constant 0 : i32
    %c0_i32_1 = arith.constant 0 : i32
    return %c0_i32, %c0_i32_0 : i32, i32
  }
  func.func @transform_3(%arg0: i32) -> (i32, i32) {
    %c0_i32 = arith.constant 0 : i32
    %c0_i32_0 = arith.constant 0 : i32
    %c0_i32_1 = arith.constant 0 : i32
    return %c0_i32, %c0_i32_0 : i32, i32
  }
  func.func @transform_4(%arg0: i32) -> (i32, i32) {
    %c0_i32 = arith.constant 0 : i32
    %c0_i32_0 = arith.constant 0 : i32
    return %arg0, %c0_i32 : i32, i32
  }
}

</mosaic_0001>

<bundles_post_ra>
// kernel: tpu_custom_call.1
= control target key start
LH: loop header
LB: loop body
LE: loop exit
PB: predicated region body
PF: predicated region fallthrough
CT: control target
= control target key end

     0   :  { %9 = vsyncpa [#allocation3], 0  ;;  %s559_s0 = inlined_call_operand.hbm [shape: f32[8,128], index: 0, kind: input, shape index: {}]   ;;  %s560_s1 = inlined_call_operand.vmem [shape: f32[1,128], index: 1, kind: input, shape index: {}]   ;;  %s561_s2 = inlined_call_operand.vmem [shape: f32[1,128], index: 2, kind: input, shape index: {}]   ;;  %s562_s3 = inlined_call_operand.hbm [shape: f32[128,128], index: 3, kind: input, shape index: {}]   ;;  %s563_s4 = inlined_call_operand.hbm [shape: f32[8,128], index: 4, kind: output, shape index: {}]  }
   0x1   :  { %10 = vsyncpa [#allocation6], 0 }
   0x2   :  { %11 = vsyncpa [#allocation4], 0  ;;  %s477_s15 = smov [#allocation2]   ;;  %s478_s17 = smov [#allocation5]  }
   0x3   :  { %s18_s16 = sshll.u32 %s477_s15, 4  ;;  %s31_s18 = sshll.u32 %s478_s17, 4  ;;  %s19_s16 = int_to_ptr.vmem [resolvable:$true] %s18_s16  ;;  %s510_s18 = int_to_ptr.vmem [resolvable:$true] %s31_s18 }
   0x4   :  { %s405_s21 = scalar_lea.hbm %s559_s0, 128 }
   0x5   :  { %p406_p0 = scmp.ne.s32.totalorder %s559_s0, %s405_s21  ;;  %p409_p1 = scmp.lt.u32.totalorder %s405_s21, %s559_s0 }
   0x7   :  { %p411_p2 = pnand %p409_p1, %p406_p0 }
   0x9   :  { %414 = shalt.err (!%p411_p2)
}
   0xa   :  { %s415_s26 = scalar_lea.vmem %s19_s16, 128  ;;  %p420_p4 = scmp.lt.s32.totalorder %s19_s16, %s19_s16 }
   0xb   :  { %p416_p3 = scmp.ne.s32.totalorder %s19_s16, %s415_s26  ;;  %p421_p5 = scmp.lt.s32.totalorder %s415_s26, %s415_s26 }
   0xd   :  { %p422_p6 = por %p421_p5, %p420_p4 }
   0xf   :  { %p423_p7 = pnand %p422_p6, %p416_p3 }
  0x11   :  { %426 = shalt.err (!%p423_p7)
}
  0x12   :  { %21 = dma.hbm_to_vmem [thread:$0]  %s559_s0, 128, %s19_s16, [#allocation3]  }
  0x13   :  { %s427_s5 = scalar_lea.hbm %s562_s3, 2048 }
  0x14   :  { %p428_p8 = scmp.ne.s32.totalorder %s562_s3, %s427_s5  ;;  %p431_p9 = scmp.lt.u32.totalorder %s427_s5, %s562_s3 }
  0x16   :  { %p433_p10 = pnand %p431_p9, %p428_p8 }
  0x18   :  { %436 = shalt.err (!%p433_p10)
}
  0x19   :  { %s437_s10 = scalar_lea.vmem %s510_s18, 2048  ;;  %p442_p12 = scmp.lt.s32.totalorder %s510_s18, %s510_s18 }
  0x1a   :  { %p438_p11 = scmp.ne.s32.totalorder %s510_s18, %s437_s10  ;;  %p443_p13 = scmp.lt.s32.totalorder %s437_s10, %s437_s10 }
  0x1c   :  { %p444_p0 = por %p443_p13, %p442_p12 }
  0x1e   :  { %p445_p1 = pnand %p444_p0, %p438_p11 }
  0x20   :  { %448 = shalt.err (!%p445_p1)
}
  0x21   :  { %s479_s0 = smov 128   ;;  %s480_s11 = smov 8  }
  0x22   :  { %37 = dma.hbm_to_vmem [thread:$0]  %s562_s3, 2048, %s510_s18, [#allocation6], %s479_s0, %s479_s0, %s480_s11  }
  0x23   :  { %471 = dma.done.wait [#allocation3], 128  }
  0x24   :  { %472 = vsyncadd [#allocation3], 4294967168 }
  0x25   :  { %473 = dma.done.wait [#allocation6], 2048  }
  0x26   :  { %474 = vsyncadd [#allocation6], 4294965248  ;;  %v481_v0 = vmov 0.0|0.0   ;;  %vm482_vm0 = vmmov 0   ;;  %v483_v1 = vmov 0.0   ;;  %v45_v2 = vld [vmem:[#allocation5] sm:$0xff] }
  0x27   :  { %347 = vmatprep.subr.bf16.mxu0 %v481_v0  ;;  %309 = vmatprep.mubr.msk.f32.mxu0 %vm482_vm0, %v483_v1  ;;  %v46_v3 = vld [vmem:[#allocation5 + $0x8] sm:$0xff]  ;;  %v47_v4 = vld [vmem:[#allocation5 + $0x10] sm:$0xff]  ;;  %v48_v6 = vld [vmem:[#allocation5 + $0x18] sm:$0xff]  ;;  %s484_s17 = smov [#allocation7]  }
  0x28   :  { %371 = vmatprep.subr.bf16.mxu1 %v481_v0  ;;  %344 = vmatprep.mubr.msk.f32.mxu1 %vm482_vm0, %v483_v1  ;;  %v348_v5 = vpack.c.bf16 %v46_v3, %v45_v2  ;;  %v351_v7 = vpack.c.bf16 %v48_v6, %v47_v4  ;;  %v49_v8 = vld [vmem:[#allocation5 + $0x20] sm:$0xff]  ;;  %v50_v9 = vld [vmem:[#allocation5 + $0x28] sm:$0xff]  ;;  %v51_v11 = vld [vmem:[#allocation5 + $0x30] sm:$0xff]  ;;  %s231_s18 = sshll.u32 %s484_s17, 4  ;;  %s232_s18 = int_to_ptr.vmem [resolvable:$true] %s231_s18 }
  0x29   :  { %v354_v10 = vpack.c.bf16 %v50_v9, %v49_v8  ;;  %v52_v12 = vld [vmem:[#allocation5 + $0x38] sm:$0xff]  ;;  %v53_v14 = vld [vmem:[#allocation5 + $0x40] sm:$0xff]  ;;  %v54_v15 = vld [vmem:[#allocation5 + $0x48] sm:$0xff]  ;;  %s449_s19 = scalar_lea.vmem %s232_s18, 128  ;;  %p454_p3 = scmp.lt.s32.totalorder %s232_s18, %s232_s18 }
  0x2a   :  { %349 = vmatpush3.bf16.msra.mxu0 %v348_v5  ;;  %373 = vmatpush3.bf16.msra.mxu1 %v348_v5  ;;  %v357_v13 = vpack.c.bf16 %v52_v12, %v51_v11  ;;  %v360_v16 = vpack.c.bf16 %v54_v15, %v53_v14  ;;  %v55_v17 = vld [vmem:[#allocation5 + $0x50] sm:$0xff]  ;;  %v56_v18 = vld [vmem:[#allocation5 + $0x58] sm:$0xff]  ;;  %v57_v20 = vld [vmem:[#allocation5 + $0x60] sm:$0xff]  ;;  %p450_p2 = scmp.ne.s32.totalorder %s232_s18, %s449_s19  ;;  %p455_p4 = scmp.lt.s32.totalorder %s449_s19, %s449_s19 }
  0x2b   :  { %350 = vmatprep.subr.bf16.mxu0 %v481_v0  ;;  %374 = vmatprep.subr.bf16.mxu1 %v481_v0  ;;  %v363_v19 = vpack.c.bf16 %v56_v18, %v55_v17  ;;  %v58_v21 = vld [vmem:[#allocation5 + $0x68] sm:$0xff]  ;;  %v59_v23 = vld [vmem:[#allocation5 + $0x70] sm:$0xff]  ;;  %v60_v24 = vld [vmem:[#allocation5 + $0x78] sm:$0xff] }
  0x2c   :  { %v366_v22 = vpack.c.bf16 %v58_v21, %v57_v20  ;;  %v369_v25 = vpack.c.bf16 %v60_v24, %v59_v23  ;;  %v44_v26 = vld [vmem:[#allocation2] sm:$0xff]  ;;  %p456_p5 = por %p455_p4, %p454_p3 }
  0x2d   :  { %v241_v37 = vld [vmem:[%s560_s1] ss:$0 sm:$0xff] }
  0x2e   :  { %352 = vmatpush3.bf16.msra.mxu0 %v351_v7  ;;  %376 = vmatpush3.bf16.msra.mxu1 %v351_v7  ;;  %v242_v39 = vld [vmem:[%s561_s2] ss:$0 sm:$0xff]  ;;  %p457_p6 = pnand %p456_p5, %p450_p2 }
  0x2f   :  { %353 = vmatprep.subr.bf16.mxu0 %v481_v0  ;;  %377 = vmatprep.subr.bf16.mxu1 %v481_v0 }
  0x32   :  { %355 = vmatpush3.bf16.msra.mxu0 %v354_v10  ;;  %379 = vmatpush3.bf16.msra.mxu1 %v354_v10 }
  0x33   :  { %356 = vmatprep.subr.bf16.mxu0 %v481_v0  ;;  %380 = vmatprep.subr.bf16.mxu1 %v481_v0 }
  0x36   :  { %358 = vmatpush3.bf16.msra.mxu0 %v357_v13  ;;  %382 = vmatpush3.bf16.msra.mxu1 %v357_v13 }
  0x37   :  { %359 = vmatprep.subr.bf16.mxu0 %v481_v0  ;;  %383 = vmatprep.subr.bf16.mxu1 %v481_v0 }
  0x3a   :  { %361 = vmatpush3.bf16.msra.mxu0 %v360_v16  ;;  %385 = vmatpush3.bf16.msra.mxu1 %v360_v16 }
  0x3b   :  { %362 = vmatprep.subr.bf16.mxu0 %v481_v0  ;;  %386 = vmatprep.subr.bf16.mxu1 %v481_v0 }
  0x3e   :  { %364 = vmatpush3.bf16.msra.mxu0 %v363_v19  ;;  %388 = vmatpush3.bf16.msra.mxu1 %v363_v19 }
  0x3f   :  { %365 = vmatprep.subr.bf16.mxu0 %v481_v0  ;;  %389 = vmatprep.subr.bf16.mxu1 %v481_v0 }
  0x42   :  { %367 = vmatpush3.bf16.msra.mxu0 %v366_v22  ;;  %391 = vmatpush3.bf16.msra.mxu1 %v366_v22 }
  0x43   :  { %368 = vmatprep.subr.bf16.mxu0 %v481_v0  ;;  %392 = vmatprep.subr.bf16.mxu1 %v481_v0 }
  0x46   :  { %370 = vmatpush3.bf16.msra.mxu0 %v369_v25  ;;  %394 = vmatpush3.bf16.msra.mxu1 %v369_v25 }
  0x49   :  { %310 = vmatmul.mubr.f32.vlgmr.msra.gmra.mrb[0].mxu0 %v44_v26 }
 0x11c   :  { %v127_v27 = vpop.f32.mrb[0].mxu0 }
 0x11d   :  { %v131_v28 = vmul.f32 0.03125, %v127_v27  ;;  %v311_v29 = vpop.f32.mrb[1].mxu0 }
 0x11f   :  { %v132_v30 = vsub.f32 %v44_v26, %v131_v28 }
 0x121   :  { %v133_v31 = vmul.f32 %v132_v30, %v132_v30 }
 0x123   :  { %345 = vmatmul.mubr.f32.vlgmr.msra.gmra.mrb[0].mxu1 %v133_v31 }
 0x1f6   :  { %v200_v32 = vpop.f32.mrb[0].mxu1 }
 0x1f7   :  { %v204_v33 = vmul.f32 0.03125, %v200_v32  ;;  %v346_v34 = vpop.f32.mrb[1].mxu1 }
 0x1f9   :  { %v205_v35 = vadd.f32 1e-12, %v204_v33 }
 0x1fb   :  { %403 = vrsqrt.f32 %v205_v35 }
 0x205   :  { %v404_v36 = vpop.eup %403 }
 0x206   :  { %v209_v38 = vmul.f32 %v404_v36, %v132_v30 }
 0x208   :  { %v216_v40 = vmul.f32 %v241_v37, %v209_v38 }
 0x20a   :  { %v223_v41 = vadd.f32 %v242_v39, %v216_v40 }
 0x20c   :  { %224 = vst [vmem:[#allocation7] sm:$0xff] %v223_v41 }
 0x20d   :  { %460 = shalt.err (!%p457_p6)
}
 0x20e   :  { %s461_s21 = scalar_lea.hbm %s563_s4, 128 }
 0x20f   :  { %p462_p7 = scmp.ne.s32.totalorder %s563_s4, %s461_s21  ;;  %p465_p8 = scmp.lt.u32.totalorder %s461_s21, %s563_s4 }
 0x211   :  { %p467_p9 = pnand %p465_p8, %p462_p7 }
 0x213   :  { %470 = shalt.err (!%p467_p9)
}
 0x214   :  { %234 = dma.vmem_to_hbm [thread:$0]  %s232_s18, 128, %s563_s4, [#allocation4]  }
 0x215   :  { %475 = dma.done.wait [#allocation4], 128  }
 0x216   :  { %476 = vsyncadd [#allocation4], 4294967168 }
 0x217   :  { %238 = vsyncpa [#allocation3], 1 }
 0x218   :  { %239 = vsyncpa [#allocation6], 1 }
 0x219   :  { %240 = vsyncpa [#allocation4], 1 }

</bundles_post_ra>
